<compile_context>
chip_gen: v5e
topology: v5e:2x2
jax: 0.10.0
libtpu: 0.0.40
codegen_flags: <defaults>
</compile_context>

<pallas_src>
import functools
import math

import jax
import jax.numpy as jnp
from jax import lax
from jax.experimental import pallas as pl
from jax.experimental.pallas import tpu as pltpu

EPS = 1e-5
LANE = 128


def _pad_channels(c, w):
    """Smallest c' >= c such that (w * c') % 128 == 0 (lane-dense slabs)."""
    step = LANE // math.gcd(w, LANE)
    return ((c + step - 1) // step) * step


def prepare_params(params, N, H, W):
    """One-time (parameter-load time) transform of PyTorch-style parameters into
    the fused banded matrices / rows the kernel consumes."""
    g1, b1, w1, g2, b2, w2, wsc = (params[k] for k in
                                   ("g1", "b1", "w1", "g2", "b2", "w2", "wsc"))
    Cout, Cin = w1.shape[0], w1.shape[1]
    Cp = _pad_channels(Cin, W)          # zero-pad input channels -> L1 = W*Cp lane-dense
    pad_i = Cp - Cin

    w1p = jnp.pad(w1, ((0, 0), (0, pad_i), (0, 0), (0, 0)))
    wscp = jnp.pad(wsc, ((0, 0), (0, pad_i), (0, 0), (0, 0)))
    g1p = jnp.pad(g1.astype(jnp.float32), (0, pad_i))
    b1p = jnp.pad(b1.astype(jnp.float32), (0, pad_i))

    def banded(k_oihw, kh, cin, cout):
        # Block-banded (W*cin, W*cout) matrix folding the kw shift (zero padded
        # in W) and the ci->co contraction for a fixed kh tap row.
        kt = jnp.transpose(k_oihw[:, :, kh, :], (2, 1, 0))        # (3, cin, cout)
        d = jnp.arange(W)[:, None] - jnp.arange(W)[None, :]       # w_in - w_out
        taps = kt[jnp.clip(d + 1, 0, 2)]                          # (W, W, cin, cout)
        taps = jnp.where((jnp.abs(d) <= 1)[:, :, None, None], taps, 0.0)
        return jnp.transpose(taps, (0, 2, 1, 3)).reshape(W * cin, W * cout)

    def fused(k_oihw, cin, cout):
        # (3*W*cin, W*cout): the kh taps stacked along the contraction dim so a
        # single MXU matmul performs the whole 3x3 conv.
        return jnp.concatenate(
            [banded(k_oihw, kh, cin, cout) for kh in range(3)],
            axis=0).astype(jnp.bfloat16)

    # 1x1 projection shortcut as a block-diagonal (W*Cp, W*Cout) matrix.
    ksc = jnp.transpose(wscp[:, :, 0, 0], (1, 0))                 # (Cp, Cout)
    msc = (jnp.eye(W, dtype=jnp.float32)[:, None, :, None]
           * ksc[None, :, None, :]).reshape(W * Cp, W * Cout).astype(jnp.bfloat16)

    return {
        "cp": Cp, "cout": Cout,
        "g1_row": jnp.tile(g1p, W).reshape(1, W * Cp),
        "b1_row": jnp.tile(b1p, W).reshape(1, W * Cp),
        "g2_row": jnp.tile(g2.astype(jnp.float32), W).reshape(1, W * Cout),
        "b2_row": jnp.tile(b2.astype(jnp.float32), W).reshape(1, W * Cout),
        "m1": fused(w1p, Cp, Cout),     # (3*W*Cp,   W*Cout) bf16
        "m2": fused(w2, Cout, Cout),    # (3*W*Cout, W*Cout) bf16
        "msc": msc,                     # (W*Cp,     W*Cout) bf16
    }


def preact_block(x_nchw, prep):
    """PreActBlock forward (stride=1, in_planes != planes => projection shortcut)."""
    N, Cin, H, W = x_nchw.shape
    Cp, Cout = int(prep["cp"]), int(prep["cout"])
    R, L1, L2 = N * H, W * Cp, W * Cout
    inv_nhw = 1.0 / float(N * H * W)

    # NCHW -> NHWC -> channel pad -> lane-dense (N*H, W*Cp) slab.  (The transpose
    # is a boundary cost of the NCHW convention; an NHWC-native caller is free.)
    x_nhwc = jnp.transpose(x_nchw, (0, 2, 3, 1)).astype(jnp.float32)
    x_nhwc = jnp.pad(x_nhwc, ((0, 0), (0, 0), (0, 0), (0, Cp - Cin)))
    x_slab = x_nhwc.reshape(R, L1)

    def kernel(x_ref, g1_ref, b1_ref, g2_ref, b2_ref,
               m1_ref, m2_ref, msc_ref, out_ref):

        def group_reduce(s, c):
            # s: (1, L) per-lane column sums, L = W*c.  Returns the per-channel
            # total replicated to all W lane groups via a cyclic lane-roll/add
            # tree: exact f32 adds on XLU/VPU, no MXU matvec, no G matrices.
            L = s.shape[1]
            w = L // c
            if w & (w - 1) == 0:                       # power-of-two W: log2 tree
                shift = c
                while shift < L:
                    s = s + pltpu.roll(s, shift, axis=1)
                    shift *= 2
                return s
            tot = s
            for k in range(1, w):                      # general W fallback
                tot = tot + pltpu.roll(s, k * c, axis=1)
            return tot

        def bn_relu(v, g_row, b_row, c):
            # Training-mode batch stats (biased var), single pass over v.
            mu = group_reduce(jnp.sum(v, axis=0, keepdims=True), c) * inv_nhw
            ex2 = group_reduce(jnp.sum(v * v, axis=0, keepdims=True), c) * inv_nhw
            var = jnp.maximum(ex2 - mu * mu, 0.0)
            scale = g_row * lax.rsqrt(var + EPS)
            return jnp.maximum(v * scale + (b_row - mu * scale), 0.0)

        def shifted_lhs(v):
            # (R, 3L) bf16 slab [v(h-1) | v(h) | v(h+1)], zero padded in H, via
            # XLU sublane rolls + iota row masks (no O(R^2) shift matmuls).
            Rr, L = v.shape
            h_of_row = lax.broadcasted_iota(jnp.int32, (Rr, L), 0) % H
            up = jnp.where(h_of_row != 0, pltpu.roll(v, 1, axis=0), 0.0)
            dn = jnp.where(h_of_row != H - 1, pltpu.roll(v, Rr - 1, axis=0), 0.0)
            return jnp.concatenate([up, v, dn], axis=1).astype(jnp.bfloat16)

        x = x_ref[...]                                            # (R, L1) f32

        # ---- bn1 + ReLU ----
        a = bn_relu(x, g1_ref[...], b1_ref[...], Cp)
        lhs1 = shifted_lhs(a)                                     # (R, 3*L1) bf16
        a16 = lhs1[:, L1:2 * L1]                                  # center taps

        # ---- projection shortcut (1x1 conv on the pre-activation); parked in
        # out_ref immediately to free register pressure across BN2/conv2 ----
        out_ref[...] = jnp.dot(a16, msc_ref[...],
                               preferred_element_type=jnp.float32)

        # ---- conv1: 3x3 / stride 1 / pad 1 as ONE fused-contraction matmul ----
        c1 = jnp.dot(lhs1, m1_ref[...], preferred_element_type=jnp.float32)

        # ---- bn2 + ReLU ----
        y = bn_relu(c1, g2_ref[...], b2_ref[...], Cout)
        lhs2 = shifted_lhs(y)                                     # (R, 3*L2) bf16

        # ---- conv2 + residual accumulate (lane-dense (R, W*Cout) output) ----
        out_ref[...] += jnp.dot(lhs2, m2_ref[...],
                                preferred_element_type=jnp.float32)

    def full(shape):
        n = len(shape)
        return pl.BlockSpec(shape, lambda i: (0,) * n)

    in_shapes = [(R, L1), (1, L1), (1, L1), (1, L2), (1, L2),
                 (3 * L1, L2), (3 * L2, L2), (L1, L2)]

    out_slab = pl.pallas_call(
        kernel,
        out_shape=jax.ShapeDtypeStruct((R, L2), jnp.float32),
        grid=(1,),
        in_specs=[full(s) for s in in_shapes],
        out_specs=full((R, L2)),       # lane-dense output: last dim = W*Cout = 128
        compiler_params=pltpu.CompilerParams(
            dimension_semantics=("arbitrary",),
            # <= default scoped VMEM on every generation; total footprint here
            # is well under 1 MiB.  Re-derive per generation once tiled (v7x).
            vmem_limit_bytes=32 * 1024 * 1024),
    )(x_slab, prep["g1_row"], prep["b1_row"], prep["g2_row"], prep["b2_row"],
      prep["m1"], prep["m2"], prep["msc"])

    # back to PyTorch NCHW
    return jnp.transpose(out_slab.reshape(N, H, W, Cout), (0, 3, 1, 2))


def _reference(x, params):
    """Pure-JAX reference (XLA convs, f32 HIGHEST) matching the PyTorch forward."""
    g1, b1, w1, g2, b2, w2, wsc = (params[k] for k in
                                   ("g1", "b1", "w1", "g2", "b2", "w2", "wsc"))

    def bn(v, g, b):
        mu = jnp.mean(v, axis=(0, 2, 3), keepdims=True)
        var = jnp.mean((v - mu) ** 2, axis=(0, 2, 3), keepdims=True)
        return (g.reshape(1, -1, 1, 1) * (v - mu) * lax.rsqrt(var + EPS)
                + b.reshape(1, -1, 1, 1))

    conv = functools.partial(lax.conv_general_dilated,
                             window_strides=(1, 1),
                             dimension_numbers=('NCHW', 'OIHW', 'NCHW'),
                             precision=lax.Precision.HIGHEST)
    out = jax.nn.relu(bn(x, g1, b1))
    shortcut = conv(out, wsc, padding='VALID')
    out = conv(out, w1, padding=((1, 1), (1, 1)))
    out = conv(jax.nn.relu(bn(out, g2, b2)), w2, padding=((1, 1), (1, 1)))
    return out + shortcut


if __name__ == "__main__":
    # PreActBlock(in_planes=4, planes=8, stride=1): projection shortcut exists.
    N, Cin, Cout, H, W = 2, 4, 8, 16, 16
    key = jax.random.PRNGKey(0)
    ks = jax.random.split(key, 8)
    x = jax.random.normal(ks[0], (N, Cin, H, W), jnp.float32)
    params = dict(
        g1=1.0 + 0.1 * jax.random.normal(ks[1], (Cin,), jnp.float32),
        b1=0.1 * jax.random.normal(ks[2], (Cin,), jnp.float32),
        w1=0.2 * jax.random.normal(ks[3], (Cout, Cin, 3, 3), jnp.float32),
        g2=1.0 + 0.1 * jax.random.normal(ks[4], (Cout,), jnp.float32),
        b2=0.1 * jax.random.normal(ks[5], (Cout,), jnp.float32),
        w2=0.2 * jax.random.normal(ks[6], (Cout, Cout, 3, 3), jnp.float32),
        wsc=0.2 * jax.random.normal(ks[7], (Cout, Cin, 1, 1), jnp.float32),
    )

    # Weight transforms done once at "parameter load" time (hoisted out of the
    # per-call forward path).
    prep = prepare_params(params, N, H, W)

    out = jax.block_until_ready(preact_block(x, prep))
    ref = jax.block_until_ready(_reference(x, params))

    assert out.shape == (N, Cout, H, W), out.shape
    # bf16 MXU operands with f32 accumulation: tolerance sized accordingly.
    if not jnp.allclose(out, ref, atol=3e-2, rtol=3e-2):
        raise SystemExit(
            f"mismatch: max abs err {float(jnp.max(jnp.abs(out - ref)))}")
    print("KERNEL_OK")
</pallas_src>

<mosaic_0001>
module attributes {stable_mosaic.version = 11 : i64} {
  func.func @kernel(%arg0: i32, %arg1: memref<32x128xf32, #tpu.memory_space<vmem>>, %arg2: memref<1x128xf32, #tpu.memory_space<vmem>>, %arg3: memref<1x128xf32, #tpu.memory_space<vmem>>, %arg4: memref<1x128xf32, #tpu.memory_space<vmem>>, %arg5: memref<1x128xf32, #tpu.memory_space<vmem>>, %arg6: memref<384x128xbf16, #tpu.memory_space<vmem>>, %arg7: memref<384x128xbf16, #tpu.memory_space<vmem>>, %arg8: memref<128x128xbf16, #tpu.memory_space<vmem>>, %arg9: memref<32x128xf32, #tpu.memory_space<vmem>>) attributes {dimension_semantics = [#tpu.dimension_semantics<arbitrary>], iteration_bounds = array<i64: 1>, scalar_prefetch = 0 : i64, scratch_operands = 0 : i64, tpu.core_type = #tpu.core_type<tc>, window_params = [{pipeline_mode = #tpu.pipeline_mode<synchronous>, transform_indices = @transform_0, window_bounds = array<i64: 32, 128>}, {pipeline_mode = #tpu.pipeline_mode<synchronous>, transform_indices = @transform_1, window_bounds = array<i64: 1, 128>}, {pipeline_mode = #tpu.pipeline_mode<synchronous>, transform_indices = @transform_2, window_bounds = array<i64: 1, 128>}, {pipeline_mode = #tpu.pipeline_mode<synchronous>, transform_indices = @transform_3, window_bounds = array<i64: 1, 128>}, {pipeline_mode = #tpu.pipeline_mode<synchronous>, transform_indices = @transform_4, window_bounds = array<i64: 1, 128>}, {pipeline_mode = #tpu.pipeline_mode<synchronous>, transform_indices = @transform_5, window_bounds = array<i64: 384, 128>}, {pipeline_mode = #tpu.pipeline_mode<synchronous>, transform_indices = @transform_6, window_bounds = array<i64: 384, 128>}, {pipeline_mode = #tpu.pipeline_mode<synchronous>, transform_indices = @transform_7, window_bounds = array<i64: 128, 128>}, {pipeline_mode = #tpu.pipeline_mode<synchronous>, transform_indices = @transform_8, window_bounds = array<i64: 32, 128>}]} {
    %c0 = arith.constant 0 : index
    %c0_0 = arith.constant 0 : index
    %0 = vector.load %arg1[%c0, %c0_0] : memref<32x128xf32, #tpu.memory_space<vmem>>, vector<32x128xf32>
    %c0_1 = arith.constant 0 : index
    %c0_2 = arith.constant 0 : index
    %1 = vector.load %arg2[%c0_1, %c0_2] : memref<1x128xf32, #tpu.memory_space<vmem>>, vector<1x128xf32>
    %c0_3 = arith.constant 0 : index
    %c0_4 = arith.constant 0 : index
    %2 = vector.load %arg3[%c0_3, %c0_4] : memref<1x128xf32, #tpu.memory_space<vmem>>, vector<1x128xf32>
    %cst = arith.constant dense<0.000000e+00> : vector<128xf32>
    %3 = vector.multi_reduction <add>, %0, %cst [0] : vector<32x128xf32> to vector<128xf32>
    %4 = vector.shape_cast %3 : vector<128xf32> to vector<1x128xf32>
    %c8_i32 = arith.constant 8 : i32
    %5 = tpu.dynamic_rotate %4 by %c8_i32 dim 1 : vector<1x128xf32>, i32 -> vector<1x128xf32>
    %6 = arith.addf %4, %5 : vector<1x128xf32>
    %c16_i32 = arith.constant 16 : i32
    %7 = tpu.dynamic_rotate %6 by %c16_i32 dim 1 : vector<1x128xf32>, i32 -> vector<1x128xf32>
    %8 = arith.addf %6, %7 : vector<1x128xf32>
    %c32_i32 = arith.constant 32 : i32
    %9 = tpu.dynamic_rotate %8 by %c32_i32 dim 1 : vector<1x128xf32>, i32 -> vector<1x128xf32>
    %10 = arith.addf %8, %9 : vector<1x128xf32>
    %c64_i32 = arith.constant 64 : i32
    %11 = tpu.dynamic_rotate %10 by %c64_i32 dim 1 : vector<1x128xf32>, i32 -> vector<1x128xf32>
    %12 = arith.addf %10, %11 : vector<1x128xf32>
    %cst_5 = arith.constant 0.001953125 : f32
    %13 = vector.broadcast %cst_5 : f32 to vector<1x128xf32>
    %14 = arith.mulf %12, %13 : vector<1x128xf32>
    %15 = arith.mulf %0, %0 : vector<32x128xf32>
    %cst_6 = arith.constant dense<0.000000e+00> : vector<128xf32>
    %16 = vector.multi_reduction <add>, %15, %cst_6 [0] : vector<32x128xf32> to vector<128xf32>
    %17 = vector.shape_cast %16 : vector<128xf32> to vector<1x128xf32>
    %c8_i32_7 = arith.constant 8 : i32
    %18 = tpu.dynamic_rotate %17 by %c8_i32_7 dim 1 : vector<1x128xf32>, i32 -> vector<1x128xf32>
    %19 = arith.addf %17, %18 : vector<1x128xf32>
    %c16_i32_8 = arith.constant 16 : i32
    %20 = tpu.dynamic_rotate %19 by %c16_i32_8 dim 1 : vector<1x128xf32>, i32 -> vector<1x128xf32>
    %21 = arith.addf %19, %20 : vector<1x128xf32>
    %c32_i32_9 = arith.constant 32 : i32
    %22 = tpu.dynamic_rotate %21 by %c32_i32_9 dim 1 : vector<1x128xf32>, i32 -> vector<1x128xf32>
    %23 = arith.addf %21, %22 : vector<1x128xf32>
    %c64_i32_10 = arith.constant 64 : i32
    %24 = tpu.dynamic_rotate %23 by %c64_i32_10 dim 1 : vector<1x128xf32>, i32 -> vector<1x128xf32>
    %25 = arith.addf %23, %24 : vector<1x128xf32>
    %cst_11 = arith.constant 0.001953125 : f32
    %26 = vector.broadcast %cst_11 : f32 to vector<1x128xf32>
    %27 = arith.mulf %25, %26 : vector<1x128xf32>
    %28 = arith.mulf %14, %14 : vector<1x128xf32>
    %29 = arith.subf %27, %28 : vector<1x128xf32>
    %cst_12 = arith.constant 0.000000e+00 : f32
    %30 = vector.broadcast %cst_12 : f32 to vector<1x128xf32>
    %31 = arith.maximumf %29, %30 : vector<1x128xf32>
    %cst_13 = arith.constant 9.99999974E-6 : f32
    %32 = vector.broadcast %cst_13 : f32 to vector<1x128xf32>
    %33 = arith.addf %31, %32 : vector<1x128xf32>
    %34 = math.rsqrt %33 : vector<1x128xf32>
    %35 = arith.mulf %1, %34 : vector<1x128xf32>
    %36 = vector.broadcast %35 : vector<1x128xf32> to vector<32x128xf32>
    %37 = arith.mulf %0, %36 : vector<32x128xf32>
    %38 = arith.mulf %14, %35 : vector<1x128xf32>
    %39 = arith.subf %2, %38 : vector<1x128xf32>
    %40 = vector.broadcast %39 : vector<1x128xf32> to vector<32x128xf32>
    %41 = arith.addf %37, %40 : vector<32x128xf32>
    %cst_14 = arith.constant 0.000000e+00 : f32
    %42 = vector.broadcast %cst_14 : f32 to vector<32x128xf32>
    %43 = arith.maximumf %41, %42 : vector<32x128xf32>
    %44 = tpu.iota {dimensions = array<i32: 0>} : vector<32x128xi32>
    %c16_i32_15 = arith.constant 16 : i32
    %c0_i32 = arith.constant 0 : i32
    %45 = arith.cmpi eq, %c16_i32_15, %c0_i32 : i32
    %c1_i32 = arith.constant 1 : i32
    %46 = arith.select %45, %c1_i32, %c16_i32_15 : i32
    %47 = vector.broadcast %46 : i32 to vector<32x128xi32>
    %48 = arith.remsi %44, %47 : vector<32x128xi32>
    %c0_i32_16 = arith.constant 0 : i32
    %49 = vector.broadcast %c0_i32_16 : i32 to vector<32x128xi32>
    %50 = arith.cmpi ne, %48, %49 : vector<32x128xi32>
    %c0_i32_17 = arith.constant 0 : i32
    %51 = vector.broadcast %c0_i32_17 : i32 to vector<32x128xi32>
    %52 = arith.cmpi slt, %48, %51 : vector<32x128xi32>
    %c0_i32_18 = arith.constant 0 : i32
    %53 = arith.cmpi slt, %46, %c0_i32_18 : i32
    %54 = vector.broadcast %53 : i1 to vector<32x128xi1>
    %55 = vector.broadcast %54 : vector<32x128xi1> to vector<32x128xi1>
    %56 = arith.xori %52, %55 : vector<32x128xi1>
    %57 = arith.andi %56, %50 : vector<32x128xi1>
    %58 = vector.broadcast %46 : i32 to vector<32x128xi32>
    %59 = arith.addi %48, %58 : vector<32x128xi32>
    %60 = arith.select %57, %59, %48 : vector<32x128xi1>, vector<32x128xi32>
    %c0_i32_19 = arith.constant 0 : i32
    %61 = vector.broadcast %c0_i32_19 : i32 to vector<32x128xi32>
    %62 = arith.cmpi ne, %60, %61 : vector<32x128xi32>
    %c1_i32_20 = arith.constant 1 : i32
    %63 = tpu.dynamic_rotate %43 by %c1_i32_20 dim 0 : vector<32x128xf32>, i32 -> vector<32x128xf32>
    %cst_21 = arith.constant 0.000000e+00 : f32
    %64 = vector.broadcast %cst_21 : f32 to vector<32x128xf32>
    %65 = arith.select %62, %63, %64 : vector<32x128xi1>, vector<32x128xf32>
    %c15_i32 = arith.constant 15 : i32
    %66 = vector.broadcast %c15_i32 : i32 to vector<32x128xi32>
    %67 = arith.cmpi ne, %60, %66 : vector<32x128xi32>
    %c31_i32 = arith.constant 31 : i32
    %68 = tpu.dynamic_rotate %43 by %c31_i32 dim 0 : vector<32x128xf32>, i32 -> vector<32x128xf32>
    %cst_22 = arith.constant 0.000000e+00 : f32
    %69 = vector.broadcast %cst_22 : f32 to vector<32x128xf32>
    %70 = arith.select %67, %68, %69 : vector<32x128xi1>, vector<32x128xf32>
    %71 = tpu.concatenate %65, %43, %70 in 1 : vector<32x128xf32>, vector<32x128xf32>, vector<32x128xf32> -> vector<32x384xf32>
    %72 = arith.truncf %71 : vector<32x384xf32> to vector<32x384xbf16>
    %73 = vector.extract_strided_slice %72 {offsets = [0, 128], sizes = [32, 128], strides = [1, 1]} : vector<32x384xbf16> to vector<32x128xbf16>
    %c0_23 = arith.constant 0 : index
    %c0_24 = arith.constant 0 : index
    %74 = vector.load %arg8[%c0_23, %c0_24] : memref<128x128xbf16, #tpu.memory_space<vmem>>, vector<128x128xbf16>
    %cst_25 = arith.constant dense<0.000000e+00> : vector<32x128xf32>
    %75 = tpu.matmul %73, %74, %cst_25 {dimension_numbers = #tpu.dot_dimension_numbers<[1], [0], [0], [1], [0, 0, 1, 1], [], []>} : vector<32x128xbf16>, vector<128x128xbf16>, vector<32x128xf32> -> vector<32x128xf32>
    %c0_26 = arith.constant 0 : index
    %c0_27 = arith.constant 0 : index
    %76 = vector.load %arg9[%c0_26, %c0_27] : memref<32x128xf32, #tpu.memory_space<vmem>>, vector<32x128xf32>
    tpu.vector_store %arg9[%c0_26, %c0_27], %75 {strides = array<i32>} : memref<32x128xf32, #tpu.memory_space<vmem>>, vector<32x128xf32>,
    %c0_28 = arith.constant 0 : index
    %c0_29 = arith.constant 0 : index
    %77 = vector.load %arg6[%c0_28, %c0_29] : memref<384x128xbf16, #tpu.memory_space<vmem>>, vector<384x128xbf16>
    %cst_30 = arith.constant dense<0.000000e+00> : vector<32x128xf32>
    %78 = tpu.matmul %72, %77, %cst_30 {dimension_numbers = #tpu.dot_dimension_numbers<[1], [0], [0], [1], [0, 0, 1, 1], [], []>} : vector<32x384xbf16>, vector<384x128xbf16>, vector<32x128xf32> -> vector<32x128xf32>
    %c0_31 = arith.constant 0 : index
    %c0_32 = arith.constant 0 : index
    %79 = vector.load %arg4[%c0_31, %c0_32] : memref<1x128xf32, #tpu.memory_space<vmem>>, vector<1x128xf32>
    %c0_33 = arith.constant 0 : index
    %c0_34 = arith.constant 0 : index
    %80 = vector.load %arg5[%c0_33, %c0_34] : memref<1x128xf32, #tpu.memory_space<vmem>>, vector<1x128xf32>
    %cst_35 = arith.constant dense<0.000000e+00> : vector<128xf32>
    %81 = vector.multi_reduction <add>, %78, %cst_35 [0] : vector<32x128xf32> to vector<128xf32>
    %82 = vector.shape_cast %81 : vector<128xf32> to vector<1x128xf32>
    %c8_i32_36 = arith.constant 8 : i32
    %83 = tpu.dynamic_rotate %82 by %c8_i32_36 dim 1 : vector<1x128xf32>, i32 -> vector<1x128xf32>
    %84 = arith.addf %82, %83 : vector<1x128xf32>
    %c16_i32_37 = arith.constant 16 : i32
    %85 = tpu.dynamic_rotate %84 by %c16_i32_37 dim 1 : vector<1x128xf32>, i32 -> vector<1x128xf32>
    %86 = arith.addf %84, %85 : vector<1x128xf32>
    %c32_i32_38 = arith.constant 32 : i32
    %87 = tpu.dynamic_rotate %86 by %c32_i32_38 dim 1 : vector<1x128xf32>, i32 -> vector<1x128xf32>
    %88 = arith.addf %86, %87 : vector<1x128xf32>
    %c64_i32_39 = arith.constant 64 : i32
    %89 = tpu.dynamic_rotate %88 by %c64_i32_39 dim 1 : vector<1x128xf32>, i32 -> vector<1x128xf32>
    %90 = arith.addf %88, %89 : vector<1x128xf32>
    %cst_40 = arith.constant 0.001953125 : f32
    %91 = vector.broadcast %cst_40 : f32 to vector<1x128xf32>
    %92 = arith.mulf %90, %91 : vector<1x128xf32>
    %93 = arith.mulf %78, %78 : vector<32x128xf32>
    %cst_41 = arith.constant dense<0.000000e+00> : vector<128xf32>
    %94 = vector.multi_reduction <add>, %93, %cst_41 [0] : vector<32x128xf32> to vector<128xf32>
    %95 = vector.shape_cast %94 : vector<128xf32> to vector<1x128xf32>
    %c8_i32_42 = arith.constant 8 : i32
    %96 = tpu.dynamic_rotate %95 by %c8_i32_42 dim 1 : vector<1x128xf32>, i32 -> vector<1x128xf32>
    %97 = arith.addf %95, %96 : vector<1x128xf32>
    %c16_i32_43 = arith.constant 16 : i32
    %98 = tpu.dynamic_rotate %97 by %c16_i32_43 dim 1 : vector<1x128xf32>, i32 -> vector<1x128xf32>
    %99 = arith.addf %97, %98 : vector<1x128xf32>
    %c32_i32_44 = arith.constant 32 : i32
    %100 = tpu.dynamic_rotate %99 by %c32_i32_44 dim 1 : vector<1x128xf32>, i32 -> vector<1x128xf32>
    %101 = arith.addf %99, %100 : vector<1x128xf32>
    %c64_i32_45 = arith.constant 64 : i32
    %102 = tpu.dynamic_rotate %101 by %c64_i32_45 dim 1 : vector<1x128xf32>, i32 -> vector<1x128xf32>
    %103 = arith.addf %101, %102 : vector<1x128xf32>
    %cst_46 = arith.constant 0.001953125 : f32
    %104 = vector.broadcast %cst_46 : f32 to vector<1x128xf32>
    %105 = arith.mulf %103, %104 : vector<1x128xf32>
    %106 = arith.mulf %92, %92 : vector<1x128xf32>
    %107 = arith.subf %105, %106 : vector<1x128xf32>
    %cst_47 = arith.constant 0.000000e+00 : f32
    %108 = vector.broadcast %cst_47 : f32 to vector<1x128xf32>
    %109 = arith.maximumf %107, %108 : vector<1x128xf32>
    %cst_48 = arith.constant 9.99999974E-6 : f32
    %110 = vector.broadcast %cst_48 : f32 to vector<1x128xf32>
    %111 = arith.addf %109, %110 : vector<1x128xf32>
    %112 = math.rsqrt %111 : vector<1x128xf32>
    %113 = arith.mulf %79, %112 : vector<1x128xf32>
    %114 = vector.broadcast %113 : vector<1x128xf32> to vector<32x128xf32>
    %115 = arith.mulf %78, %114 : vector<32x128xf32>
    %116 = arith.mulf %92, %113 : vector<1x128xf32>
    %117 = arith.subf %80, %116 : vector<1x128xf32>
    %118 = vector.broadcast %117 : vector<1x128xf32> to vector<32x128xf32>
    %119 = arith.addf %115, %118 : vector<32x128xf32>
    %cst_49 = arith.constant 0.000000e+00 : f32
    %120 = vector.broadcast %cst_49 : f32 to vector<32x128xf32>
    %121 = arith.maximumf %119, %120 : vector<32x128xf32>
    %122 = tpu.iota {dimensions = array<i32: 0>} : vector<32x128xi32>
    %c16_i32_50 = arith.constant 16 : i32
    %c0_i32_51 = arith.constant 0 : i32
    %123 = arith.cmpi eq, %c16_i32_50, %c0_i32_51 : i32
    %c1_i32_52 = arith.constant 1 : i32
    %124 = arith.select %123, %c1_i32_52, %c16_i32_50 : i32
    %125 = vector.broadcast %124 : i32 to vector<32x128xi32>
    %126 = arith.remsi %122, %125 : vector<32x128xi32>
    %c0_i32_53 = arith.constant 0 : i32
    %127 = vector.broadcast %c0_i32_53 : i32 to vector<32x128xi32>
    %128 = arith.cmpi ne, %126, %127 : vector<32x128xi32>
    %c0_i32_54 = arith.constant 0 : i32
    %129 = vector.broadcast %c0_i32_54 : i32 to vector<32x128xi32>
    %130 = arith.cmpi slt, %126, %129 : vector<32x128xi32>
    %c0_i32_55 = arith.constant 0 : i32
    %131 = arith.cmpi slt, %124, %c0_i32_55 : i32
    %132 = vector.broadcast %131 : i1 to vector<32x128xi1>
    %133 = vector.broadcast %132 : vector<32x128xi1> to vector<32x128xi1>
    %134 = arith.xori %130, %133 : vector<32x128xi1>
    %135 = arith.andi %134, %128 : vector<32x128xi1>
    %136 = vector.broadcast %124 : i32 to vector<32x128xi32>
    %137 = arith.addi %126, %136 : vector<32x128xi32>
    %138 = arith.select %135, %137, %126 : vector<32x128xi1>, vector<32x128xi32>
    %c0_i32_56 = arith.constant 0 : i32
    %139 = vector.broadcast %c0_i32_56 : i32 to vector<32x128xi32>
    %140 = arith.cmpi ne, %138, %139 : vector<32x128xi32>
    %c1_i32_57 = arith.constant 1 : i32
    %141 = tpu.dynamic_rotate %121 by %c1_i32_57 dim 0 : vector<32x128xf32>, i32 -> vector<32x128xf32>
    %cst_58 = arith.constant 0.000000e+00 : f32
    %142 = vector.broadcast %cst_58 : f32 to vector<32x128xf32>
    %143 = arith.select %140, %141, %142 : vector<32x128xi1>, vector<32x128xf32>
    %c15_i32_59 = arith.constant 15 : i32
    %144 = vector.broadcast %c15_i32_59 : i32 to vector<32x128xi32>
    %145 = arith.cmpi ne, %138, %144 : vector<32x128xi32>
    %c31_i32_60 = arith.constant 31 : i32
    %146 = tpu.dynamic_rotate %121 by %c31_i32_60 dim 0 : vector<32x128xf32>, i32 -> vector<32x128xf32>
    %cst_61 = arith.constant 0.000000e+00 : f32
    %147 = vector.broadcast %cst_61 : f32 to vector<32x128xf32>
    %148 = arith.select %145, %146, %147 : vector<32x128xi1>, vector<32x128xf32>
    %149 = tpu.concatenate %143, %121, %148 in 1 : vector<32x128xf32>, vector<32x128xf32>, vector<32x128xf32> -> vector<32x384xf32>
    %150 = arith.truncf %149 : vector<32x384xf32> to vector<32x384xbf16>
    %c0_62 = arith.constant 0 : index
    %c0_63 = arith.constant 0 : index
    %151 = vector.load %arg9[%c0_62, %c0_63] : memref<32x128xf32, #tpu.memory_space<vmem>>, vector<32x128xf32>
    %c0_64 = arith.constant 0 : index
    %c0_65 = arith.constant 0 : index
    %152 = vector.load %arg7[%c0_64, %c0_65] : memref<384x128xbf16, #tpu.memory_space<vmem>>, vector<384x128xbf16>
    %cst_66 = arith.constant dense<0.000000e+00> : vector<32x128xf32>
    %153 = tpu.matmul %150, %152, %cst_66 {dimension_numbers = #tpu.dot_dimension_numbers<[1], [0], [0], [1], [0, 0, 1, 1], [], []>} : vector<32x384xbf16>, vector<384x128xbf16>, vector<32x128xf32> -> vector<32x128xf32>
    %154 = arith.addf %151, %153 : vector<32x128xf32>
    %c0_67 = arith.constant 0 : index
    %c0_68 = arith.constant 0 : index
    %155 = vector.load %arg9[%c0_67, %c0_68] : memref<32x128xf32, #tpu.memory_space<vmem>>, vector<32x128xf32>
    tpu.vector_store %arg9[%c0_67, %c0_68], %154 {strides = array<i32>} : memref<32x128xf32, #tpu.memory_space<vmem>>, vector<32x128xf32>,
    return
  }
  func.func @transform_0(%arg0: i32) -> (i32, i32) {
    %c0_i32 = arith.constant 0 : i32
    %c0_i32_0 = arith.constant 0 : i32
    %c0_i32_1 = arith.constant 0 : i32
    return %c0_i32, %c0_i32_0 : i32, i32
  }
  func.func @transform_1(%arg0: i32) -> (i32, i32) {
    %c0_i32 = arith.constant 0 : i32
    %c0_i32_0 = arith.constant 0 : i32
    %c0_i32_1 = arith.constant 0 : i32
    return %c0_i32, %c0_i32_0 : i32, i32
  }
  func.func @transform_2(%arg0: i32) -> (i32, i32) {
    %c0_i32 = arith.constant 0 : i32
    %c0_i32_0 = arith.constant 0 : i32
    %c0_i32_1 = arith.constant 0 : i32
    return %c0_i32, %c0_i32_0 : i32, i32
  }
  func.func @transform_3(%arg0: i32) -> (i32, i32) {
    %c0_i32 = arith.constant 0 : i32
    %c0_i32_0 = arith.constant 0 : i32
    %c0_i32_1 = arith.constant 0 : i32
    return %c0_i32, %c0_i32_0 : i32, i32
  }
  func.func @transform_4(%arg0: i32) -> (i32, i32) {
    %c0_i32 = arith.constant 0 : i32
    %c0_i32_0 = arith.constant 0 : i32
    %c0_i32_1 = arith.constant 0 : i32
    return %c0_i32, %c0_i32_0 : i32, i32
  }
  func.func @transform_5(%arg0: i32) -> (i32, i32) {
    %c0_i32 = arith.constant 0 : i32
    %c0_i32_0 = arith.constant 0 : i32
    %c0_i32_1 = arith.constant 0 : i32
    return %c0_i32, %c0_i32_0 : i32, i32
  }
  func.func @transform_6(%arg0: i32) -> (i32, i32) {
    %c0_i32 = arith.constant 0 : i32
    %c0_i32_0 = arith.constant 0 : i32
    %c0_i32_1 = arith.constant 0 : i32
    return %c0_i32, %c0_i32_0 : i32, i32
  }
  func.func @transform_7(%arg0: i32) -> (i32, i32) {
    %c0_i32 = arith.constant 0 : i32
    %c0_i32_0 = arith.constant 0 : i32
    %c0_i32_1 = arith.constant 0 : i32
    return %c0_i32, %c0_i32_0 : i32, i32
  }
  func.func @transform_8(%arg0: i32) -> (i32, i32) {
    %c0_i32 = arith.constant 0 : i32
    %c0_i32_0 = arith.constant 0 : i32
    %c0_i32_1 = arith.constant 0 : i32
    return %c0_i32, %c0_i32_0 : i32, i32
  }
}

</mosaic_0001>

<bundles_post_ra>
// kernel: tpu_custom_call.1
= control target key start
LH: loop header
LB: loop body
LE: loop exit
PB: predicated region body
PF: predicated region fallthrough
CT: control target
= control target key end

     0   :  { %13 = vsyncpa [#allocation3], 0  ;;  %s1761_s0 = inlined_call_operand.hbm [shape: f32[32,128], index: 0, kind: input, shape index: {}]   ;;  %s1762_s1 = inlined_call_operand.hbm [shape: f32[1,128], index: 1, kind: input, shape index: {}]   ;;  %s1763_s2 = inlined_call_operand.vmem [shape: f32[1,128], index: 2, kind: input, shape index: {}]   ;;  %s1764_s3 = inlined_call_operand.vmem [shape: f32[1,128], index: 3, kind: input, shape index: {}]   ;;  %s1765_s4 = inlined_call_operand.vmem [shape: f32[1,128], index: 4, kind: input, shape index: {}]   ;;  %s1766_s5 = inlined_call_operand.hbm [shape: bf16[384,128], index: 5, kind: input, shape index: {}]   ;;  %s1767_s6 = inlined_call_operand.hbm [shape: bf16[384,128], index: 6, kind: input, shape index: {}]   ;;  %s1768_s7 = inlined_call_operand.hbm [shape: bf16[128,128], index: 7, kind: input, shape index: {}]   ;;  %s1769_s8 = inlined_call_operand.hbm [shape: f32[32,128], index: 8, kind: output, shape index: {}]  }
   0x1   :  { %14 = vsyncpa [#allocation6], 0 }
   0x2   :  { %15 = vsyncpa [#allocation9], 0  ;;  %s35_s29 = sshll.u32 %s1762_s1, 4  ;;  %s36_s29 = int_to_ptr.hbm [resolvable:$true] %s35_s29 }
   0x3   :  { %16 = vsyncpa [#allocation4], 0  ;;  %s1524_s30 = smov [#allocation5]   ;;  %s64_s12 = sshll.u32 %s1767_s6, 4  ;;  %s65_s12 = int_to_ptr.hbm [resolvable:$true] %s64_s12 }
   0x4   :  { %s37_s9 = sshll.u32 %s1524_s30, 4  ;;  %s1525_s13 = smov [#allocation8]   ;;  %s38_s9 = int_to_ptr.vmem [resolvable:$true] %s37_s9 }
   0x5   :  { %40 = dma.hbm_to_vmem [thread:$0]  %s36_s29, 16, %s38_s9, [#allocation6]  }
   0x6   :  { %s66_s14 = sshll.u32 %s1525_s13, 4  ;;  %s21_s17 = sshll.u32 %s1761_s0, 4  ;;  %s67_s14 = int_to_ptr.vmem [resolvable:$true] %s66_s14  ;;  %s22_s17 = int_to_ptr.hbm [resolvable:$true] %s21_s17 }
   0x7   :  { %s1526_s1 = smov 64   ;;  %s1527_s18 = smov 4  }
   0x8   :  { %72 = dma.hbm_to_vmem [thread:$0]  %s65_s12, 3072, %s67_s14, [#allocation9], %s1526_s1, %s1526_s1, %s1527_s18  }
   0x9   :  { %s1528_s19 = smov [#allocation2]   ;;  %s51_s6 = sshll.u32 %s1766_s5, 4  ;;  %s52_s6 = int_to_ptr.hbm [resolvable:$true] %s51_s6 }
   0xa   :  { %s23_s20 = sshll.u32 %s1528_s19, 4  ;;  %s1529_s23 = smov 128   ;;  %s24_s20 = int_to_ptr.vmem [resolvable:$true] %s23_s20 }
   0xb   :  { %s1530_s24 = smov 8   ;;  %s1531_s0 = smov [#allocation7]  }
   0xc   :  { %29 = dma.hbm_to_vmem [thread:$0]  %s22_s17, 512, %s24_s20, [#allocation3], %s1529_s23, %s1529_s23, %s1530_s24  }
   0xd   :  { %s53_s25 = sshll.u32 %s1531_s0, 4  ;;  %s77_s28 = sshll.u32 %s1768_s7, 4  ;;  %s54_s25 = int_to_ptr.vmem [resolvable:$true] %s53_s25  ;;  %s78_s28 = int_to_ptr.hbm [resolvable:$true] %s77_s28 }
   0xe   :  { %59 = dma.hbm_to_vmem [thread:$0]  %s52_s6, 3072, %s54_s25, [#allocation6], %s1526_s1, %s1526_s1, %s1527_s18  }
   0xf   :  { %s1532_s29 = smov [#allocation10]  }
  0x10   :  { %s79_s5 = sshll.u32 %s1532_s29, 4  ;;  %s80_s5 = int_to_ptr.vmem [resolvable:$true] %s79_s5 }
  0x11   :  { %85 = dma.hbm_to_vmem [thread:$0]  %s78_s28, 1024, %s80_s5, [#allocation9], %s1526_s1, %s1526_s1, %s1527_s18  }
  0x12   :  { %1516 = dma.done.wait [#allocation3], 512  }
  0x13   :  { %1517 = vsyncadd [#allocation3], 4294966784 }
  0x14   :  { %1518 = dma.done.wait [#allocation6], 3088  }
  0x15   :  { %1519 = vsyncadd [#allocation6], 4294964208 }
  0x16   :  { %1520 = dma.done.wait [#allocation9], 4096  }
  0x17   :  { %1521 = vsyncadd [#allocation9], 4294963200  ;;  %v1606_v0 = vld [vmem:[#allocation2] sm:$0xff]  ;;  %v1608_v1 = vld [vmem:[#allocation2 + $0x8] sm:$0xff]  ;;  %s1533_s7 = smov 16   ;;  %s1534_s30 = smov 32  }
  0x18   :  { %v1610_v2 = vld [vmem:[#allocation2 + $0x10] sm:$0xff]  ;;  %v112_v3 = vadd.f32 %v1608_v1, %v1606_v0  ;;  %v134_v4 = vmul.f32 %v1606_v0, %v1606_v0  ;;  %v135_v5 = vmul.f32 %v1608_v1, %v1608_v1  ;;  %v1620_v7 = vld [vmem:[#allocation2 + $0x18] sm:$0xff]  ;;  %v1295_v52 = vld [vmem:[#allocation10 + $0x20] sm:$0xff]  ;;  %vm1535_vm12 = vmmov 1   ;;  %s1040_s16 = sshll.u32 %s1769_s8, 4  ;;  %s1041_s16 = int_to_ptr.hbm [resolvable:$true] %s1040_s16 }
  0x19   :  { %v136_v6 = vmul.f32 %v1610_v2, %v1610_v2  ;;  %v137_v9 = vmul.f32 %v1620_v7, %v1620_v7  ;;  %v1298_v38 = vld [vmem:[#allocation10 + $0x38] sm:$0xff]  ;;  %v1297_v42 = vld [vmem:[#allocation10 + $0x30] sm:$0xff]  ;;  %v1296_v47 = vld [vmem:[#allocation10 + $0x28] sm:$0xff] }
  0x1a   :  { %v113_v8 = vadd.f32 %v112_v3, %v1610_v2  ;;  %v138_v10 = vadd.f32 %v135_v5, %v134_v4  ;;  %v1306_v39 = vld [vmem:[#allocation7 + $0x38] sm:$0xff]  ;;  %366 = vmatpush.bf16.msra.mxu0 %v1298_v38  ;;  %v1305_v43 = vld [vmem:[#allocation7 + $0x30] sm:$0xff]  ;;  %v1304_v48 = vld [vmem:[#allocation7 + $0x28] sm:$0xff] }
  0x1b   :  { %v1314_v40 = vld [vmem:[#allocation7 + $0x78] sm:$0xff]  ;;  %601 = vmatpush.bf16.msra.mxu1 %v1306_v39  ;;  %v1313_v44 = vld [vmem:[#allocation7 + $0x70] sm:$0xff]  ;;  %v1312_v49 = vld [vmem:[#allocation7 + $0x68] sm:$0xff] }
  0x1c   :  { %v114_v11 = vadd.f32 %v113_v8, %v1620_v7  ;;  %v139_v12 = vadd.f32 %v138_v10, %v136_v6  ;;  %v1322_v41 = vld [vmem:[#allocation7 + $0xb8] sm:$0xff]  ;;  %620 = vmatpush.bf16.msra.mxu2 %v1314_v40  ;;  %v1321_v45 = vld [vmem:[#allocation7 + $0xb0] sm:$0xff]  ;;  %v1320_v51 = vld [vmem:[#allocation7 + $0xa8] sm:$0xff] }
  0x1d   :  { %639 = vmatpush.bf16.msra.mxu3 %v1322_v41  ;;  %v1303_v53 = vld [vmem:[#allocation7 + $0x20] sm:$0xff]  ;;  %v1294_v59 = vld [vmem:[#allocation10 + $0x18] sm:$0xff]  ;;  %v1293_v4 = vld [vmem:[#allocation10 + $0x10] sm:$0xff] }
  0x1e   :  { %v115_v13 = vrot.slane %v114_v11, 4  ;;  %v140_v14 = vadd.f32 %v139_v12, %v137_v9  ;;  %367 = vmatpush.bf16.msra.mxu0 %v1297_v42  ;;  %v1311_v54 = vld [vmem:[#allocation7 + $0x60] sm:$0xff]  ;;  %v1302_v60 = vld [vmem:[#allocation7 + $0x18] sm:$0xff]  ;;  %v1301_v5 = vld [vmem:[#allocation7 + $0x10] sm:$0xff] }
  0x1f   :  { %602 = vmatpush.bf16.msra.mxu1 %v1305_v43  ;;  %v1319_v56 = vld [vmem:[#allocation7 + $0xa0] sm:$0xff]  ;;  %v1310_v61 = vld [vmem:[#allocation7 + $0x58] sm:$0xff]  ;;  %v1309_v8 = vld [vmem:[#allocation7 + $0x50] sm:$0xff] }
  0x20   :  { %v116_v15 = vadd.f32 %v115_v13, %v114_v11  ;;  %v141_v16 = vrot.slane %v140_v14, 4  ;;  %621 = vmatpush.bf16.msra.mxu2 %v1313_v44  ;;  %v1318_v3 = vld [vmem:[#allocation7 + $0x98] sm:$0xff]  ;;  %v1317_v9 = vld [vmem:[#allocation7 + $0x90] sm:$0xff]  ;;  %v1292_v11 = vld [vmem:[#allocation10 + $0x8] sm:$0xff] }
  0x21   :  { %640 = vmatpush.bf16.msra.mxu3 %v1321_v45  ;;  %v1300_v12 = vld [vmem:[#allocation7 + $0x8] sm:$0xff] }
  0x22   :  { %v117_v17 = vrot.slane %v116_v15, 2  ;;  %v142_v18 = vadd.f32 %v141_v16, %v140_v14  ;;  %368 = vmatpush.bf16.msra.mxu0 %v1296_v47  ;;  %v1308_v14 = vld [vmem:[#allocation7 + $0x48] sm:$0xff]  ;;  %v1291_v16 = vld [vmem:[#allocation10] sm:$0xff] }
  0x23   :  { %603 = vmatpush.bf16.msra.mxu1 %v1304_v48 }
  0x24   :  { %v118_v19 = vadd.f32 %v117_v17, %v116_v15  ;;  %v143_v20 = vrot.slane %v142_v18, 2  ;;  %622 = vmatpush.bf16.msra.mxu2 %v1312_v49  ;;  %v1316_v15 = vld [vmem:[#allocation7 + $0x88] sm:$0xff]  ;;  %v1299_v17 = vld [vmem:[#allocation7] sm:$0xff] }
  0x25   :  { %641 = vmatpush.bf16.msra.mxu3 %v1320_v51 }
  0x26   :  { %v119_v21 = vrot.slane %v118_v19, 1  ;;  %v144_v22 = vadd.f32 %v143_v20, %v142_v18  ;;  %369 = vmatpush.bf16.msra.mxu0 %v1295_v52  ;;  %v1307_v18 = vld [vmem:[#allocation7 + $0x40] sm:$0xff] }
  0x27   :  { %604 = vmatpush.bf16.msra.mxu1 %v1303_v53 }
  0x28   :  { %v120_v23 = vadd.f32 %v119_v21, %v118_v19  ;;  %v145_v24 = vrot.slane %v144_v22, 1  ;;  %623 = vmatpush.bf16.msra.mxu2 %v1311_v54  ;;  %v1315_v19 = vld [vmem:[#allocation7 + $0x80] sm:$0xff] }
  0x29   :  { %642 = vmatpush.bf16.msra.mxu3 %v1319_v56 }
  0x2a   :  { %121 = vrot.lane.b32.xlu0 %v120_v23, %s1530_s24  ;;  %v146_v25 = vadd.f32 %v145_v24, %v144_v22  ;;  %370 = vmatpush.bf16.msra.mxu0 %v1294_v59 }
  0x2b   :  { %605 = vmatpush.bf16.msra.mxu1 %v1302_v60 }
  0x2c   :  { %624 = vmatpush.bf16.msra.mxu2 %v1310_v61 }
  0x2d   :  { %643 = vmatpush.bf16.msra.mxu3 %v1318_v3 }
  0x2e   :  { %371 = vmatpush.bf16.msra.mxu0 %v1293_v4 }
  0x2f   :  { %606 = vmatpush.bf16.msra.mxu1 %v1301_v5 }
  0x30   :  { %625 = vmatpush.bf16.msra.mxu2 %v1309_v8 }
  0x31   :  { %644 = vmatpush.bf16.msra.mxu3 %v1317_v9 }
  0x32   :  { %147 = vrot.lane.b32.xlu0 %v146_v25, %s1530_s24  ;;  %372 = vmatpush.bf16.msra.mxu0 %v1292_v11 }
  0x33   :  { %607 = vmatpush.bf16.msra.mxu1 %v1300_v12 }
  0x34   :  { %626 = vmatpush.bf16.msra.mxu2 %v1308_v14 }
  0x35   :  { %645 = vmatpush.bf16.msra.mxu3 %v1316_v15 }
  0x36   :  { %373 = vmatpush.bf16.msra.mxu0 %v1291_v16 }
  0x37   :  { %608 = vmatpush.bf16.msra.mxu1 %v1299_v17 }
  0x38   :  { %627 = vmatpush.bf16.msra.mxu2 %v1307_v18 }
  0x39   :  { %646 = vmatpush.bf16.msra.mxu3 %v1315_v19 }
  0x9c   :  { %v122_v26 = vpop.permute.xlu0 %121 }
  0x9d   :  { %v123_v27 = vadd.f32 %v122_v26, %v120_v23 }
  0x9f   :  { %124 = vrot.lane.b32.xlu1 %v123_v27, %s1533_s7 }
  0xa4   :  { %v148_v28 = vpop.permute.xlu0 %147 }
  0xa5   :  { %v149_v29 = vadd.f32 %v148_v28, %v146_v25  ;;  %v110_v25 = vld [vmem:[#allocation5] sm:$0x1] }
  0xa7   :  { %150 = vrot.lane.b32.xlu1 %v149_v29, %s1533_s7 }
 0x111   :  { %v125_v30 = vpop.permute.xlu1 %124 }
 0x112   :  { %v126_v31 = vadd.f32 %v125_v30, %v123_v27  ;;  %v195_v27 = vlaneseq  ;;  %v111_v30 = vld [vmem:[%s1763_s2] sm:$0x1] }
 0x114   :  { %127 = vrot.lane.b32.xlu2 %v126_v31, %s1534_s30 }
 0x119   :  { %v151_v32 = vpop.permute.xlu1 %150 }
 0x11a   :  { %v152_v33 = vadd.f32 %v151_v32, %v149_v29 }
 0x11c   :  { %153 = vrot.lane.b32.xlu2 %v152_v33, %s1534_s30 }
 0x16e   :  { %v128_v34 = vpop.permute.xlu2 %127 }
 0x16f   :  { %v129_v35 = vadd.f32 %v128_v34, %v126_v31  ;;  %v1637_v31 = vshrl.u32 %v195_v27, 7 }
 0x171   :  { %130 = vrot.lane.b32.xlu0 %v129_v35, %s1526_s1  ;;  %v204_v41 = vand.u32 15, %v1637_v31  ;;  %vm256_vm4 = vcmp.lt.s32.totalorder %v1637_v31, 1  ;;  %vm273_vm5 = vcmp.lt.s32.totalorder %v1637_v31, 7 }
 0x173   :  { %vm1645_vm3 = vcmp.ne.s32.totalorder %v204_v41, 0 }
 0x174   :  { %vm1279_vm13 = vmpackc.low %vm1535_vm12, %vm1645_vm3 }
 0x176   :  { %v154_v36 = vpop.permute.xlu2 %153 }
 0x177   :  { %v155_v37 = vadd.f32 %v154_v36, %v152_v33  ;;  %v197_v36 = vadd.s32 8, %v1637_v31 }
 0x179   :  { %156 = vrot.lane.b32.xlu1 %v155_v37, %s1526_s1 }
 0x1e3   :  { %v131_v46 = vpop.permute.xlu0 %130 }
 0x1e4   :  { %v132_v50 = vadd.f32 %v131_v46, %v129_v35  ;;  %v211_v46 = vand.u32 15, %v197_v36 }
 0x1e6   :  { %v133_v55 = vmul.f32 0.001953125, %v132_v50  ;;  %vm1651_vm6 = vcmp.ne.s32.totalorder %v211_v46, 15 }
 0x1e7   :  { %vm1285_vm15 = vmpackc.low %vm1651_vm6, %vm1535_vm12 }
 0x1e8   :  { %v160_v62 = vmul.f32 %v133_v55, %v133_v55 }
 0x1eb   :  { %v157_v57 = vpop.permute.xlu1 %156 }
 0x1ec   :  { %v158_v58 = vadd.f32 %v157_v57, %v155_v37 }
 0x1ee   :  { %v159_v63 = vmul.f32 0.001953125, %v158_v58  ;;  %v199_v58 = vadd.s32 24, %v1637_v31 }
 0x1f0   :  { %v161_v6 = vsub.f32 %v159_v63, %v160_v62  ;;  %v225_v15 = vand.u32 15, %v199_v58 }
 0x1f2   :  { %v162_v10 = vmax.f32 %v161_v6, 0.0  ;;  %vm1675_vm8 = vcmp.ne.s32.totalorder %v225_v15, 15 }
 0x1f4   :  { %v163_v13 = vadd.f32 1e-05, %v162_v10 }
 0x1f6   :  { %1368 = vrsqrt.f32 %v163_v13  ;;  %vm170_vm1 = vweird.f32 %v163_v13 }
 0x1fc   :  { %v1369_v20 = vpop.eup %1368 }
 0x1fd   :  { %v165_v21 = vmul.f32 %v1369_v20, %v163_v13  ;;  %vm171_vm0 = vweird.f32 %v1369_v20 }
 0x1fe   :  { %vm172_vm2 = vmor %vm170_vm1, %vm171_vm0 }
 0x1ff   :  { %v166_v22 = vmul.f32 %v1369_v20, %v165_v21  ;;  %vm1288_vm0 = vmpackc.low %vm1675_vm8, %vm1535_vm12 }
 0x201   :  { %v167_v23 = vmul.f32 0.5, %v166_v22 }
 0x203   :  { %v168_v24 = vsub.f32 1.5, %v167_v23 }
 0x205   :  { %v169_v26 = vmul.f32 %v1369_v20, %v168_v24 }
 0x207   :  { %v173_v28 = vsel %vm172_vm2, %v1369_v20, %v169_v26 }
 0x208   :  { %v174_v29 = vmul.f32 %v173_v28, %v110_v25 }
 0x20a   :  { %v176_v32 = vperm.slane %v174_v29, 0  ;;  %v182_v33 = vmul.f32 %v174_v29, %v133_v55  ;;  %v198_v55 = vadd.s32 16, %v1637_v31 }
 0x20c   :  { %v183_v34 = vsub.f32 %v111_v30, %v182_v33  ;;  %v178_v35 = vmul.f32 %v176_v32, %v1606_v0  ;;  %v179_v38 = vmul.f32 %v176_v32, %v1608_v1  ;;  %v181_v39 = vmul.f32 %v176_v32, %v1620_v7 }
 0x20d   :  { %v180_v40 = vmul.f32 %v176_v32, %v1610_v2  ;;  %v218_v9 = vand.u32 15, %v198_v55 }
 0x20e   :  { %v185_v37 = vperm.slane %v183_v34, 0 }
 0x20f   :  { %vm1669_vm7 = vcmp.ne.s32.totalorder %v218_v9, 0 }
 0x210   :  { %v187_v42 = vadd.f32 %v185_v37, %v178_v35  ;;  %v188_v43 = vadd.f32 %v185_v37, %v179_v38  ;;  %v190_v44 = vadd.f32 %v185_v37, %v181_v39  ;;  %v189_v45 = vadd.f32 %v185_v37, %v180_v40  ;;  %vm1282_vm14 = vmpackc.low %vm1535_vm12, %vm1669_vm7 }
 0x212   :  { %v191_v47 = vmax.f32 %v187_v42, 0.0  ;;  %v192_v48 = vmax.f32 %v188_v43, 0.0  ;;  %v194_v49 = vmax.f32 %v190_v44, 0.0  ;;  %v193_v0 = vmax.f32 %v189_v45, 0.0 }
 0x214   :  { %v252_v1 = vrot.slane %v191_v47, 7  ;;  %v253_v2 = vrot.slane %v192_v48, 7  ;;  %v255_v7 = vrot.slane %v194_v49, 7  ;;  %v269_v51 = vrot.slane %v191_v47, 1 }
 0x215   :  { %v270_v53 = vrot.slane %v192_v48, 1  ;;  %v271_v54 = vrot.slane %v193_v0, 1  ;;  %v254_v13 = vrot.slane %v193_v0, 7  ;;  %v272_v16 = vrot.slane %v194_v49, 1 }
 0x216   :  { %v259_v56 = vsel %vm256_vm4, %v252_v1, %v253_v2  ;;  %v260_v57 = vsel %vm256_vm4, %v255_v7, %v252_v1 }
 0x217   :  { %v261_v59 = vsel %vm1645_vm3, %v260_v57, 0.0  ;;  %v284_v60 = vpack.c.bf16 %v192_v48, %v259_v56  ;;  %v275_v61 = vsel %vm273_vm5, %v270_v53, %v271_v54  ;;  %v276_v62 = vsel %vm273_vm5, %v269_v51, %v270_v53 }
 0x218   :  { %v282_v63 = vpack.c.bf16 %v191_v47, %v261_v59  ;;  %v279_v3 = vsel %vm1651_vm6, %v275_v61, 0.0  ;;  %v283_v4 = vpack.c.bf16 %v276_v62, %v276_v62  ;;  %v258_v21 = vsel %vm256_vm4, %v253_v2, %v254_v13 }
 0x219   :  { %v311_v5 = vunpack.c.h.b16 %v284_v60  ;;  %v443_v6 = vunpack.c.l.b16 %v284_v60  ;;  %v285_v8 = vpack.c.bf16 %v279_v3, %v279_v3  ;;  %v277_v23 = vsel %vm273_vm5, %v272_v16, %v269_v51 }
 0x21a   :  { %v310_v10 = vunpack.c.h.b16 %v282_v63  ;;  %v441_v11 = vunpack.c.l.b16 %v282_v63  ;;  %v442_v12 = vunpack.c.l.b16 %v283_v4  ;;  %v257_v24 = vsel %vm256_vm4, %v254_v13, %v255_v7 }
 0x21b   :  { %v444_v14 = vunpack.c.l.b16 %v285_v8  ;;  %v263_v25 = vsel %vm1669_vm7, %v258_v21, 0.0  ;;  %v274_v26 = vsel %vm273_vm5, %v271_v54, %v272_v16  ;;  %v281_v27 = vsel %vm1675_vm8, %v277_v23, 0.0 }
 0x21c   :  { %v314_v17 = vpack.c.b16 %v311_v5, %v310_v10  ;;  %v449_v18 = vpack.c.b16 %v443_v6, %v441_v11  ;;  %v286_v28 = vpack.c.bf16 %v193_v0, %v263_v25  ;;  %v288_v29 = vpack.c.bf16 %v194_v49, %v257_v24 }
 0x21d   :  { %v450_v19 = vpack.c.b16 %v444_v14, %v442_v12  ;;  %v287_v30 = vpack.c.bf16 %v274_v26, %v274_v26  ;;  %v289_v32 = vpack.c.bf16 %v281_v27, %v281_v27 }
 0x21e   :  { %374 = vmatmul.bf16.vlgmr.msra.gmra.mxu0 %v314_v17  ;;  %609 = vmatmul.bf16.vlgmr.msra.gmra.mxu1 %v449_v18  ;;  %v312_v33 = vunpack.c.h.b16 %v286_v28  ;;  %v313_v34 = vunpack.c.h.b16 %v288_v29  ;;  %v445_v35 = vunpack.c.l.b16 %v286_v28  ;;  %v447_v36 = vunpack.c.l.b16 %v288_v29 }
 0x21f   :  { %628 = vmatmul.bf16.vlgmr.msra.gmra.mxu2 %v314_v17  ;;  %647 = vmatmul.bf16.vlgmr.msra.gmra.mxu3 %v450_v19  ;;  %v446_v37 = vunpack.c.l.b16 %v287_v30  ;;  %v448_v38 = vunpack.c.l.b16 %v289_v32 }
 0x220   :  { %v315_v39 = vpack.c.b16 %v313_v34, %v312_v33  ;;  %v451_v40 = vpack.c.b16 %v447_v36, %v445_v35 }
 0x221   :  { %v452_v41 = vpack.c.b16 %v448_v38, %v446_v37  ;;  %v1338_v37 = vld [vmem:[#allocation8 + $0x78] sm:$0xff] }
 0x222   :  { %988 = vmatpush.bf16.msrb.mxu1 %v1338_v37  ;;  %v1346_v38 = vld [vmem:[#allocation8 + $0xb8] sm:$0xff] }
 0x223   :  { %1007 = vmatpush.bf16.msrb.mxu2 %v1346_v38 }
 0x22e   :  { %379 = vmatmul.bf16.gmra.mxu0 %v315_v39  ;;  %614 = vmatmul.bf16.gmra.mxu1 %v451_v40  ;;  %v1337_v40 = vld [vmem:[#allocation8 + $0x70] sm:$0xff] }
 0x22f   :  { %633 = vmatmul.bf16.gmra.mxu2 %v315_v39  ;;  %652 = vmatmul.bf16.gmra.mxu3 %v452_v41  ;;  %v1330_v39 = vld [vmem:[#allocation8 + $0x38] sm:$0xff]  ;;  %v1345_v41 = vld [vmem:[#allocation8 + $0xb0] sm:$0xff] }
 0x230   :  { %969 = vmatpush.bf16.msrb.mxu0 %v1330_v39  ;;  %1347 = vmatpush.bf16.msrb.mxu3 %v1330_v39 }
 0x231   :  { %989 = vmatpush.bf16.msrb.mxu1 %v1337_v40  ;;  %1008 = vmatpush.bf16.msrb.mxu2 %v1345_v41 }
 0x29b   :  { %v610_v42 = vpop.f32.mrf.mxu1  ;;  %v375_v52 = vpop.f32.mrf.mxu0 }
 0x2a2   :  { %v629_v43 = vpop.f32.mrf.mxu2  ;;  %v648_v44 = vpop.f32.mrf.mxu3 }
 0x2a3   :  { %v612_v45 = vpop.f32.mrf.mxu1  ;;  %v630_v2 = vadd.f32 %v629_v43, %v610_v42  ;;  %v1329_v42 = vld [vmem:[#allocation8 + $0x30] sm:$0xff] }
 0x2a4   :  { %970 = vmatpush.bf16.msrb.mxu0 %v1329_v42  ;;  %1348 = vmatpush.bf16.msrb.mxu3 %v1329_v42 }
 0x2a5   :  { %v1691_v53 = vadd.f32 %v648_v44, %v630_v2  ;;  %v1336_v44 = vld [vmem:[#allocation8 + $0x68] sm:$0xff] }
 0x2a6   :  { %990 = vmatpush.bf16.msrb.mxu1 %v1336_v44 }
 0x2a7   :  { %v682_v58 = vmul.f32 %v1691_v53, %v1691_v53 }
 0x2aa   :  { %v631_v46 = vpop.f32.mrf.mxu2  ;;  %v650_v47 = vpop.f32.mrf.mxu3 }
 0x2ab   :  { %v615_v48 = vpop.f32.mrf.mxu1  ;;  %v632_v49 = vadd.f32 %v631_v46, %v612_v45  ;;  %v1344_v46 = vld [vmem:[#allocation8 + $0xa8] sm:$0xff] }
 0x2ac   :  { %1009 = vmatpush.bf16.msrb.mxu2 %v1344_v46 }
 0x2ad   :  { %v1689_v51 = vadd.f32 %v650_v47, %v632_v49  ;;  %v1328_v47 = vld [vmem:[#allocation8 + $0x28] sm:$0xff] }
 0x2ae   :  { %971 = vmatpush.bf16.msrb.mxu0 %v1328_v47  ;;  %1349 = vmatpush.bf16.msrb.mxu3 %v1328_v47 }
 0x2af   :  { %v683_v55 = vmul.f32 %v1689_v51, %v1689_v51  ;;  %v660_v59 = vadd.f32 %v1689_v51, %v1691_v53 }
 0x2b1   :  { %v686_v63 = vadd.f32 %v683_v55, %v682_v58  ;;  %v1333_v58 = vld [vmem:[#allocation8 + $0x50] sm:$0xff] }
 0x2b2   :  { %v634_v0 = vpop.f32.mrf.mxu2  ;;  %v653_v1 = vpop.f32.mrf.mxu3 }
 0x2b3   :  { %v635_v7 = vadd.f32 %v634_v0, %v615_v48  ;;  %v617_v56 = vpop.f32.mrf.mxu1  ;;  %v1335_v48 = vld [vmem:[#allocation8 + $0x60] sm:$0xff] }
 0x2b4   :  { %991 = vmatpush.bf16.msrb.mxu1 %v1335_v48  ;;  %v1343_v0 = vld [vmem:[#allocation8 + $0xa0] sm:$0xff] }
 0x2b5   :  { %v1693_v54 = vadd.f32 %v653_v1, %v635_v7  ;;  %v1327_v1 = vld [vmem:[#allocation8 + $0x20] sm:$0xff]  ;;  %v1334_v7 = vld [vmem:[#allocation8 + $0x58] sm:$0xff]  ;;  %1010 = vmatpush.bf16.msrb.mxu2 %v1343_v0 }
 0x2b6   :  { %972 = vmatpush.bf16.msrb.mxu0 %v1327_v1  ;;  %1350 = vmatpush.bf16.msrb.mxu3 %v1327_v1 }
 0x2b7   :  { %v684_v60 = vmul.f32 %v1693_v54, %v1693_v54  ;;  %v661_v3 = vadd.f32 %v660_v59, %v1693_v54 }
 0x2b8   :  { %992 = vmatpush.bf16.msrb.mxu1 %v1334_v7 }
 0x2b9   :  { %v687_v5 = vadd.f32 %v686_v63, %v684_v60  ;;  %v1325_v63 = vld [vmem:[#allocation8 + $0x10] sm:$0xff] }
 0x2ba   :  { %v636_v57 = vpop.f32.mrf.mxu2  ;;  %v655_v62 = vpop.f32.mrf.mxu3 }
 0x2bb   :  { %v637_v61 = vadd.f32 %v636_v57, %v617_v56  ;;  %v1342_v56 = vld [vmem:[#allocation8 + $0x98] sm:$0xff] }
 0x2bc   :  { %v1326_v57 = vld [vmem:[#allocation8 + $0x18] sm:$0xff]  ;;  %1011 = vmatpush.bf16.msrb.mxu2 %v1342_v56  ;;  %993 = vmatpush.bf16.msrb.mxu1 %v1333_v58 }
 0x2bd   :  { %v1704_v4 = vadd.f32 %v655_v62, %v637_v61  ;;  %973 = vmatpush.bf16.msrb.mxu0 %v1326_v57  ;;  %v1341_v62 = vld [vmem:[#allocation8 + $0x90] sm:$0xff]  ;;  %1351 = vmatpush.bf16.msrb.mxu3 %v1326_v57 }
 0x2bf   :  { %v662_v6 = vadd.f32 %v661_v3, %v1704_v4  ;;  %v685_v8 = vmul.f32 %v1704_v4, %v1704_v4  ;;  %v1332_v3 = vld [vmem:[#allocation8 + $0x48] sm:$0xff] }
 0x2c0   :  { %1012 = vmatpush.bf16.msrb.mxu2 %v1341_v62  ;;  %994 = vmatpush.bf16.msrb.mxu1 %v1332_v3 }
 0x2c1   :  { %v663_v9 = vrot.slane %v662_v6, 4  ;;  %v688_v10 = vadd.f32 %v687_v5, %v685_v8  ;;  %974 = vmatpush.bf16.msrb.mxu0 %v1325_v63  ;;  %v1340_v8 = vld [vmem:[#allocation8 + $0x88] sm:$0xff]  ;;  %1352 = vmatpush.bf16.msrb.mxu3 %v1325_v63 }
 0x2c3   :  { %v664_v11 = vadd.f32 %v663_v9, %v662_v6  ;;  %v689_v12 = vrot.slane %v688_v10, 4  ;;  %v1324_v9 = vld [vmem:[#allocation8 + $0x8] sm:$0xff] }
 0x2c4   :  { %1013 = vmatpush.bf16.msrb.mxu2 %v1340_v8 }
 0x2c5   :  { %v665_v13 = vrot.slane %v664_v11, 2  ;;  %v690_v14 = vadd.f32 %v689_v12, %v688_v10  ;;  %v1331_v10 = vld [vmem:[#allocation8 + $0x40] sm:$0xff]  ;;  %975 = vmatpush.bf16.msrb.mxu0 %v1324_v9  ;;  %1353 = vmatpush.bf16.msrb.mxu3 %v1324_v9 }
 0x2c6   :  { %v1323_v12 = vld [vmem:[#allocation8] sm:$0xff]  ;;  %995 = vmatpush.bf16.msrb.mxu1 %v1331_v10 }
 0x2c7   :  { %v666_v15 = vadd.f32 %v665_v13, %v664_v11  ;;  %v691_v16 = vrot.slane %v690_v14, 2  ;;  %v1339_v11 = vld [vmem:[#allocation8 + $0x80] sm:$0xff] }
 0x2c8   :  { %1014 = vmatpush.bf16.msrb.mxu2 %v1339_v11 }
 0x2c9   :  { %v667_v17 = vrot.slane %v666_v15, 1  ;;  %v692_v18 = vadd.f32 %v691_v16, %v690_v14  ;;  %976 = vmatpush.bf16.msrb.mxu0 %v1323_v12  ;;  %1354 = vmatpush.bf16.msrb.mxu3 %v1323_v12 }
 0x2cb   :  { %v668_v19 = vadd.f32 %v667_v17, %v666_v15  ;;  %v693_v21 = vrot.slane %v692_v18, 1 }
 0x2cd   :  { %669 = vrot.lane.b32.xlu2 %v668_v19, %s1530_s24  ;;  %v694_v23 = vadd.f32 %v693_v21, %v692_v18  ;;  %v658_v18 = vld [vmem:[%s1764_s3] sm:$0x1]  ;;  %s1536_s3 = smov [#allocation11]  }
 0x2cf   :  { %695 = vrot.lane.b32.xlu0 %v694_v23, %s1530_s24 }
 0x327   :  { %v670_v24 = vpop.permute.xlu2 %669 }
 0x328   :  { %v671_v25 = vadd.f32 %v670_v24, %v668_v19  ;;  %v659_v24 = vld [vmem:[%s1765_s4] sm:$0x1]  ;;  %s1038_s4 = sshll.u32 %s1536_s3, 4  ;;  %s1039_s4 = int_to_ptr.vmem [resolvable:$true] %s1038_s4 }
 0x32a   :  { %672 = vrot.lane.b32.xlu1 %v671_v25, %s1533_s7 }
 0x341   :  { %v696_v26 = vpop.permute.xlu0 %695 }
 0x342   :  { %v697_v27 = vadd.f32 %v696_v26, %v694_v23 }
 0x344   :  { %698 = vrot.lane.b32.xlu2 %v697_v27, %s1533_s7 }
 0x39c   :  { %v673_v28 = vpop.permute.xlu1 %672 }
 0x39d   :  { %v674_v29 = vadd.f32 %v673_v28, %v671_v25 }
 0x39e   :  { %v699_v30 = vpop.permute.xlu2 %698 }
 0x39f   :  { %v700_v32 = vadd.f32 %v699_v30, %v697_v27  ;;  %675 = vrot.lane.b32.xlu0 %v674_v29, %s1534_s30 }
 0x3a1   :  { %701 = vrot.lane.b32.xlu1 %v700_v32, %s1534_s30 }
 0x411   :  { %v676_v33 = vpop.permute.xlu0 %675 }
 0x412   :  { %v677_v34 = vadd.f32 %v676_v33, %v674_v29 }
 0x413   :  { %v702_v35 = vpop.permute.xlu1 %701 }
 0x414   :  { %v703_v36 = vadd.f32 %v702_v35, %v700_v32  ;;  %678 = vrot.lane.b32.xlu2 %v677_v34, %s1526_s1 }
 0x416   :  { %704 = vrot.lane.b32.xlu0 %v703_v36, %s1526_s1 }
 0x46e   :  { %v679_v43 = vpop.permute.xlu2 %678 }
 0x46f   :  { %v680_v45 = vadd.f32 %v679_v43, %v677_v34 }
 0x471   :  { %v681_v49 = vmul.f32 0.001953125, %v680_v45 }
 0x473   :  { %v708_v59 = vmul.f32 %v681_v49, %v681_v49 }
 0x488   :  { %v705_v2 = vpop.permute.xlu0 %704 }
 0x489   :  { %v706_v55 = vadd.f32 %v705_v2, %v703_v36 }
 0x48b   :  { %v707_v60 = vmul.f32 0.001953125, %v706_v55 }
 0x48d   :  { %v709_v61 = vsub.f32 %v707_v60, %v708_v59  ;;  %v377_v59 = vpop.f32.mrf.mxu0 }
 0x48f   :  { %v710_v5 = vmax.f32 %v709_v61, 0.0 }
 0x491   :  { %v711_v6 = vadd.f32 1e-05, %v710_v5 }
 0x493   :  { %1370 = vrsqrt.f32 %v711_v6  ;;  %vm718_vm10 = vweird.f32 %v711_v6 }
 0x495   :  { %v380_v60 = vpop.f32.mrf.mxu0 }
 0x499   :  { %v1371_v13 = vpop.eup %1370 }
 0x49a   :  { %v713_v14 = vmul.f32 %v1371_v13, %v711_v6  ;;  %vm719_vm9 = vweird.f32 %v1371_v13 }
 0x49b   :  { %vm720_vm11 = vmor %vm718_vm10, %vm719_vm9 }
 0x49c   :  { %v714_v15 = vmul.f32 %v1371_v13, %v713_v14 }
 0x49d   :  { %v382_v61 = vpop.f32.mrf.mxu0 }
 0x49e   :  { %v715_v16 = vmul.f32 0.5, %v714_v15 }
 0x4a0   :  { %v716_v17 = vsub.f32 1.5, %v715_v16 }
 0x4a2   :  { %v717_v19 = vmul.f32 %v1371_v13, %v716_v17 }
 0x4a4   :  { %v721_v21 = vsel %vm720_vm11, %v1371_v13, %v717_v19 }
 0x4a5   :  { %v722_v23 = vmul.f32 %v721_v21, %v658_v18 }
 0x4a7   :  { %v724_v25 = vperm.slane %v722_v23, 0  ;;  %v730_v26 = vmul.f32 %v722_v23, %v681_v49 }
 0x4a9   :  { %v731_v27 = vsub.f32 %v659_v24, %v730_v26  ;;  %v726_v28 = vmul.f32 %v724_v25, %v1691_v53  ;;  %v727_v29 = vmul.f32 %v724_v25, %v1689_v51  ;;  %v729_v32 = vmul.f32 %v724_v25, %v1704_v4 }
 0x4aa   :  { %v728_v33 = vmul.f32 %v724_v25, %v1693_v54 }
 0x4ab   :  { %v733_v30 = vperm.slane %v731_v27, 0 }
 0x4ad   :  { %v735_v34 = vadd.f32 %v733_v30, %v726_v28  ;;  %v736_v35 = vadd.f32 %v733_v30, %v727_v29  ;;  %v738_v36 = vadd.f32 %v733_v30, %v729_v32  ;;  %v737_v37 = vadd.f32 %v733_v30, %v728_v33 }
 0x4af   :  { %v739_v38 = vmax.f32 %v735_v34, 0.0  ;;  %v740_v39 = vmax.f32 %v736_v35, 0.0  ;;  %v742_v40 = vmax.f32 %v738_v36, 0.0  ;;  %v741_v41 = vmax.f32 %v737_v37, 0.0 }
 0x4b1   :  { %v768_v42 = vpack.c.bf16 %v740_v39, %v739_v38  ;;  %v743_v43 = vrot.slane %v739_v38, 7  ;;  %v744_v44 = vrot.slane %v740_v39, 7  ;;  %v746_v45 = vrot.slane %v742_v40, 7 }
 0x4b2   :  { %v745_v53 = vrot.slane %v741_v41, 7  ;;  %v755_v46 = vrot.slane %v739_v38, 1  ;;  %v756_v51 = vrot.slane %v740_v39, 1  ;;  %v757_v47 = vrot.slane %v741_v41, 1 }
 0x4b3   :  { %996 = vmatmul.bf16.vlgmr.msrb.gmra.mxu1 %v768_v42  ;;  %v749_v54 = vsel %vm256_vm4, %v743_v43, %v744_v44  ;;  %v750_v4 = vsel %vm256_vm4, %v746_v45, %v743_v43  ;;  %v758_v55 = vrot.slane %v742_v40, 1  ;;  %v771_v56 = vpack.c.bf16 %v742_v40, %v741_v41 }
 0x4b4   :  { %v1280_v48 = vpack.c.bf16 %v749_v54, %v750_v4  ;;  %v747_v49 = vsel %vm256_vm4, %v745_v53, %v746_v45  ;;  %v748_v0 = vsel %vm256_vm4, %v744_v44, %v745_v53  ;;  %v760_v1 = vsel %vm273_vm5, %v756_v51, %v757_v47 }
 0x4b5   :  { %v1283_v2 = vpack.c.bf16 %v747_v49, %v748_v0  ;;  %v761_v50 = vsel %vm273_vm5, %v755_v46, %v756_v51  ;;  %v759_v20 = vsel %vm273_vm5, %v757_v47, %v758_v55  ;;  %v762_v57 = vsel %vm273_vm5, %v758_v55, %v755_v46 }
 0x4b6   :  { %1281 = vmatmul.msk.bf16.vlgmr.msrb.gmra.mxu0 %vm1279_vm13, %v1280_v48  ;;  %v1286_v7 = vpack.c.bf16 %v760_v1, %v761_v50  ;;  %v1289_v58 = vpack.c.bf16 %v762_v57, %v759_v20 }
 0x4b7   :  { %1284 = vmatmul.msk.bf16.vlgmr.msrb.gmra.mxu3 %vm1282_vm14, %v1283_v2 }
 0x4b8   :  { %1287 = vmatmul.msk.bf16.vlgmr.msrb.gmra.mxu2 %vm1285_vm15, %v1286_v7 }
 0x4c3   :  { %1001 = vmatmul.bf16.gmra.mxu1 %v771_v56 }
 0x4c8   :  { %1290 = vmatmul.msk.bf16.gmra.mxu2 %vm1288_vm0, %v1289_v58 }
 0x530   :  { %v997_v62 = vpop.f32.mrf.mxu1 }
 0x533   :  { %v978_v63 = vpop.f32.mrf.mxu0 }
 0x534   :  { %v998_v3 = vadd.f32 %v997_v62, %v978_v63 }
 0x538   :  { %v999_v5 = vpop.f32.mrf.mxu1 }
 0x53a   :  { %v983_v14 = vpop.f32.mrf.mxu3 }
 0x53b   :  { %v1016_v6 = vpop.f32.mrf.mxu2  ;;  %v980_v10 = vpop.f32.mrf.mxu0 }
 0x53c   :  { %v1017_v8 = vadd.f32 %v1016_v6, %v998_v3  ;;  %v1000_v31 = vadd.f32 %v999_v5, %v980_v10 }
 0x53e   :  { %v1026_v9 = vadd.f32 %v1017_v8, %v375_v52 }
 0x540   :  { %1030 = vst [vmem:[#allocation11] sm:$0xff] %v1026_v9  ;;  %v1002_v22 = vpop.f32.mrf.mxu1 }
 0x541   :  { %v1003_v15 = vadd.f32 %v1002_v22, %v983_v14 }
 0x542   :  { %v985_v21 = vpop.f32.mrf.mxu3 }
 0x543   :  { %v1018_v11 = vpop.f32.mrf.mxu2 }
 0x544   :  { %v1019_v12 = vadd.f32 %v1018_v11, %v1000_v31 }
 0x546   :  { %v1027_v13 = vadd.f32 %v1019_v12, %v377_v59 }
 0x548   :  { %1031 = vst [vmem:[#allocation11 + $0x8] sm:$0xff] %v1027_v13  ;;  %v1004_v19 = vpop.f32.mrf.mxu1 }
 0x549   :  { %v1005_v23 = vadd.f32 %v1004_v19, %v985_v21 }
 0x54b   :  { %v1021_v16 = vpop.f32.mrf.mxu2 }
 0x54c   :  { %v1022_v17 = vadd.f32 %v1021_v16, %v1003_v15 }
 0x54e   :  { %v1028_v18 = vadd.f32 %v1022_v17, %v380_v60 }
 0x550   :  { %1032 = vst [vmem:[#allocation11 + $0x10] sm:$0xff] %v1028_v18 }
 0x553   :  { %v1023_v24 = vpop.f32.mrf.mxu2 }
 0x554   :  { %v1024_v25 = vadd.f32 %v1023_v24, %v1005_v23 }
 0x556   :  { %v1029_v26 = vadd.f32 %v1024_v25, %v382_v61 }
 0x558   :  { %1033 = vst [vmem:[#allocation11 + $0x18] sm:$0xff] %v1029_v26 }
 0x559   :  { %1046 = dma.vmem_to_hbm [thread:$0]  %s1039_s4, 512, %s1041_s16, [#allocation4], %s1529_s23, %s1529_s23, %s1530_s24  }
 0x55a   :  { %1522 = dma.done.wait [#allocation4], 512  }
 0x55b   :  { %1523 = vsyncadd [#allocation4], 4294966784 }
 0x55c   :  { %1051 = vsyncpa [#allocation3], 1 }
 0x55d   :  { %1052 = vsyncpa [#allocation6], 1 }
 0x55e   :  { %1053 = vsyncpa [#allocation9], 1 }
 0x55f   :  { %1054 = vsyncpa [#allocation4], 1 }

</bundles_post_ra>
